<compile_context>
chip_gen: v6e
topology: v6e:2x2x1
jax: 0.10.0
libtpu: 0.0.40
codegen_flags: <defaults>
</compile_context>

<pallas_src>
import functools

import jax
import jax.numpy as jnp
from jax import lax
from jax.experimental import pallas as pl
from jax.experimental.pallas import tpu as pltpu


# -----------------------------------------------------------------------------
# Kernel 1: hoisted 1x1-conv projections (q1,k1 from x1; q2,k2,v from x2).
# -----------------------------------------------------------------------------
def _proj_kernel(x1_ref, x2_ref, wqk_ref, bqk_ref, wv_ref, bv_ref,
                 q1_ref, k1_ref, q2_ref, k2_ref, v_ref):
    cq = q1_ref.shape[2]
    x1 = x1_ref[0]                                   # (tn, C) bf16
    x2 = x2_ref[0]                                   # (tn, C) bf16

    # bf16 MXU operands, f32 accumulation, f32 bias add.
    qk1 = jnp.dot(x1, wqk_ref[...], preferred_element_type=jnp.float32) + bqk_ref[...]
    qk2 = jnp.dot(x2, wqk_ref[...], preferred_element_type=jnp.float32) + bqk_ref[...]
    vv = jnp.dot(x2, wv_ref[...], preferred_element_type=jnp.float32) + bv_ref[...]

    q1_ref[0] = qk1[:, :cq].astype(q1_ref.dtype)
    k1_ref[0] = qk1[:, cq:].astype(k1_ref.dtype)
    q2_ref[0] = qk2[:, :cq].astype(q2_ref.dtype)
    k2_ref[0] = qk2[:, cq:].astype(k2_ref.dtype)
    v_ref[0] = vv.astype(v_ref.dtype)


# -----------------------------------------------------------------------------
# Kernel 2: dual position-attention core for one (batch, query-tile).
# -----------------------------------------------------------------------------
def _attn_kernel(q1_ref, q2_ref, k1_ref, k2_ref, v_ref, x2_ref, gamma_ref,
                 out_ref, *, bf16_exp):
    gamma = gamma_ref[0]                             # f32 scalar from SMEM

    q1 = q1_ref[0]                                   # (tq, Cq) bf16
    q2 = q2_ref[0]                                   # (tq, Cq) bf16
    k1 = k1_ref[0]                                   # (N,  Cq) bf16
    k2 = k2_ref[0]                                   # (N,  Cq) bf16
    v = v_ref[0]                                     # (N,  C)  bf16

    # Energies as NT contractions (no explicit transpose), f32 accumulation.
    nt = (((1,), (1,)), ((), ()))
    e1 = lax.dot_general(q1, k1, nt, preferred_element_type=jnp.float32)  # (tq, N)
    e2 = lax.dot_general(q2, k2, nt, preferred_element_type=jnp.float32)  # (tq, N)

    def softmax_rows(e):                             # row softmax over keys
        m = jnp.max(e, axis=-1, keepdims=True)
        z = e - m
        if bf16_exp:
            # bf16 EUP path (v6e/v7x); row sums stay f32.
            p = jnp.exp(z.astype(jnp.bfloat16))
            s = jnp.sum(p, axis=-1, keepdims=True, dtype=jnp.float32)
            return p * pl.reciprocal(s, approx=True).astype(jnp.bfloat16)
        p = jnp.exp(z)                               # f32 (v5e and fallback)
        s = jnp.sum(p, axis=-1, keepdims=True)
        return p * pl.reciprocal(s, approx=True)

    # gamma*o1 + gamma*o2 == gamma * ((a1 + a2) @ v)   (exact rewrite)
    a12 = (softmax_rows(e1) + softmax_rows(e2)).astype(jnp.bfloat16)      # (tq, N)
    o = jnp.dot(a12, v, preferred_element_type=jnp.float32)               # (tq, C)

    out_ref[0] = x2_ref[0] + gamma * o               # exact f32 residual


# -----------------------------------------------------------------------------
# Wrapper helpers
# -----------------------------------------------------------------------------
def _pick_tile(n):
    for t in (512, 256, 128, 64, 32, 16, 8):
        if t <= n and n % t == 0:
            return t
    return n


def _vmem_limit_bytes():
    """~80% of the per-core VMEM; conservative 64 MiB assumption if the query
    fails (safe on every TPU generation)."""
    try:
        cap = int(pltpu.get_tpu_info().vmem_capacity_bytes)
    except Exception:
        cap = 64 * 1024 * 1024
    return max(16 * 1024 * 1024, int(cap * 0.8))


def _bf16_exp_supported():
    """bf16 EUP path exists on v6e / v7x; keep f32 exp on v5e and older."""
    try:
        kind = jax.devices()[0].device_kind.lower()
    except Exception:
        return False
    return any(t in kind for t in ("v6", "v7", "7x"))


def _spec(shape, index_map, *, single_buffer=False):
    if single_buffer:
        return pl.BlockSpec(shape, index_map, pipeline_mode=pl.Buffered(1))
    return pl.BlockSpec(shape, index_map)


def _project(x1_bf, x2_bf, wqk, bqk, wv_b, bv2, *, n_tile, vmem_bytes, single_buffer):
    B, N, C = x1_bf.shape
    cq2 = wqk.shape[1]
    cq = cq2 // 2

    qk_spec = pl.BlockSpec((1, n_tile, cq), lambda b, i: (b, i, 0))
    return pl.pallas_call(
        _proj_kernel,
        out_shape=(
            jax.ShapeDtypeStruct((B, N, cq), jnp.bfloat16),   # q1
            jax.ShapeDtypeStruct((B, N, cq), jnp.bfloat16),   # k1
            jax.ShapeDtypeStruct((B, N, cq), jnp.bfloat16),   # q2
            jax.ShapeDtypeStruct((B, N, cq), jnp.bfloat16),   # k2
            jax.ShapeDtypeStruct((B, N, C), jnp.bfloat16),    # v
        ),
        grid_spec=pltpu.PrefetchScalarGridSpec(
            num_scalar_prefetch=0,
            grid=(B, N // n_tile),
            in_specs=[
                pl.BlockSpec((1, n_tile, C), lambda b, i: (b, i, 0)),              # x1
                pl.BlockSpec((1, n_tile, C), lambda b, i: (b, i, 0)),              # x2
                _spec((C, cq2), lambda b, i: (0, 0), single_buffer=single_buffer),  # [wq|wk]
                _spec((1, cq2), lambda b, i: (0, 0), single_buffer=single_buffer),  # [bq|bk]
                _spec((C, C), lambda b, i: (0, 0), single_buffer=single_buffer),    # wv
                _spec((1, C), lambda b, i: (0, 0), single_buffer=single_buffer),    # bv
            ],
            out_specs=[
                qk_spec, qk_spec, qk_spec, qk_spec,
                pl.BlockSpec((1, n_tile, C), lambda b, i: (b, i, 0)),
            ],
        ),
        compiler_params=pltpu.CompilerParams(
            dimension_semantics=("parallel", "parallel"),
            vmem_limit_bytes=vmem_bytes,
        ),
    )(x1_bf, x2_bf, wqk, bqk, wv_b, bv2)


def _attend(q1, k1, q2, k2, v, x2_res, gamma1, *, q_tile, vmem_bytes,
            bf16_exp, single_buffer):
    B, N, cq = q1.shape
    C = v.shape[2]

    kernel = functools.partial(_attn_kernel, bf16_exp=bf16_exp)
    tile_q = pl.BlockSpec((1, q_tile, cq), lambda b, i: (b, i, 0))
    return pl.pallas_call(
        kernel,
        out_shape=jax.ShapeDtypeStruct((B, N, C), jnp.float32),
        grid_spec=pltpu.PrefetchScalarGridSpec(
            num_scalar_prefetch=0,
            grid=(B, N // q_tile),
            in_specs=[
                tile_q,                                                             # q1
                tile_q,                                                             # q2
                _spec((1, N, cq), lambda b, i: (b, 0, 0), single_buffer=single_buffer),  # k1
                _spec((1, N, cq), lambda b, i: (b, 0, 0), single_buffer=single_buffer),  # k2
                _spec((1, N, C), lambda b, i: (b, 0, 0), single_buffer=single_buffer),   # v
                pl.BlockSpec((1, q_tile, C), lambda b, i: (b, i, 0)),               # x2 residual (f32)
                pl.BlockSpec(memory_space=pltpu.MemorySpace.SMEM),                  # gamma
            ],
            out_specs=pl.BlockSpec((1, q_tile, C), lambda b, i: (b, i, 0)),
        ),
        compiler_params=pltpu.CompilerParams(
            dimension_semantics=("parallel", "parallel"),
            vmem_limit_bytes=vmem_bytes,
        ),
    )(q1, q2, k1, k2, v, x2_res, gamma1)


def mam_module_pallas(x1_nchw, x2_nchw, wq, bq, wk, bk, wv, bv, gamma, *, q_tile=None):
    """x1_nchw, x2_nchw: (B, C, H, W) float32.
       wq, wk: (C, C//8)   bq, bk: (C//8,)
       wv: (C, C)          bv: (C,)
       gamma: scalar."""
    B, C, H, W = x1_nchw.shape
    N = H * W
    Cq = wq.shape[1]

    if q_tile is None:
        q_tile = _pick_tile(N)
    assert N % q_tile == 0
    assert q_tile == N or q_tile % 8 == 0
    n_tile = q_tile                       # token-tile for the projection pass

    # NCHW -> (B, N, C), n = h*W + w (matches torch .view(B, C, H*W)).  The
    # bf16 cast for projection inputs is fused with this transpose; the
    # residual copy of x2 stays f32 and is fed tile-indexed.
    x1_f = jnp.transpose(x1_nchw.reshape(B, C, N), (0, 2, 1)).astype(jnp.float32)
    x2_f = jnp.transpose(x2_nchw.reshape(B, C, N), (0, 2, 1)).astype(jnp.float32)
    x1_bf = x1_f.astype(jnp.bfloat16)
    x2_bf = x2_f.astype(jnp.bfloat16)

    # Merged projection weights [wq | wk] in bf16; biases stay f32.
    wqk = jnp.concatenate([wq, wk], axis=1).astype(jnp.bfloat16)       # (C, 2Cq)
    bqk = jnp.concatenate([bq, bk]).reshape(1, 2 * Cq).astype(jnp.float32)
    wv_b = wv.astype(jnp.bfloat16)                                     # (C, C)
    bv2 = bv.reshape(1, C).astype(jnp.float32)
    g1 = jnp.asarray(gamma, jnp.float32).reshape(1,)

    vmem_bytes = _vmem_limit_bytes()

    def _forward(single_buffer, bf16_exp):
        q1, k1, q2, k2, v = _project(
            x1_bf, x2_bf, wqk, bqk, wv_b, bv2,
            n_tile=n_tile, vmem_bytes=vmem_bytes, single_buffer=single_buffer)
        return _attend(
            q1, k1, q2, k2, v, x2_f, g1,
            q_tile=q_tile, vmem_bytes=vmem_bytes,
            bf16_exp=bf16_exp, single_buffer=single_buffer)

    try:
        out_flat = _forward(single_buffer=True, bf16_exp=_bf16_exp_supported())
    except Exception:
        # Conservative fallback if Buffered(1) / bf16 exp is unsupported here.
        out_flat = _forward(single_buffer=False, bf16_exp=False)

    # (B, N, C) -> NCHW
    return jnp.transpose(out_flat, (0, 2, 1)).reshape(B, C, H, W)


def mam_module_ref(x1_nchw, x2_nchw, wq, bq, wk, bk, wv, bv, gamma):
    """Pure-JAX f32 reference mirroring the PyTorch forward exactly."""
    B, C, H, W = x1_nchw.shape
    N = H * W

    def conv1x1(x, w, b):  # x: (B,C,H,W), w: (Cin, Cout), b: (Cout,)
        xf = x.reshape(B, C, N)                                  # (B, C, N)
        return jnp.einsum('bcn,co->bon', xf, w) + b[None, :, None]

    q1 = jnp.transpose(conv1x1(x1_nchw, wq, bq), (0, 2, 1))      # (B, N, Cq)
    k1 = conv1x1(x1_nchw, wk, bk)                                # (B, Cq, N)
    a1 = jax.nn.softmax(jnp.einsum('bnc,bcm->bnm', q1, k1), axis=-1)
    q2 = jnp.transpose(conv1x1(x2_nchw, wq, bq), (0, 2, 1))
    k2 = conv1x1(x2_nchw, wk, bk)
    a2 = jax.nn.softmax(jnp.einsum('bnc,bcm->bnm', q2, k2), axis=-1)
    v = conv1x1(x2_nchw, wv, bv)                                 # (B, C, N)
    o1 = jnp.einsum('bcn,bmn->bcm', v, a1).reshape(B, C, H, W)
    o2 = jnp.einsum('bcn,bmn->bcm', v, a2).reshape(B, C, H, W)
    return x2_nchw + gamma * o2 + gamma * o1


if __name__ == "__main__":
    key = jax.random.PRNGKey(0)
    B, C, H, W = 2, 32, 16, 16          # in_dim=32 -> query/key channels = 4
    Cq = C // 8

    ks = jax.random.split(key, 8)
    x1 = jax.random.normal(ks[0], (B, C, H, W), jnp.float32)
    x2 = jax.random.normal(ks[1], (B, C, H, W), jnp.float32)

    # Conv2d 1x1 weights stored transposed as (Cin, Cout).
    wq = jax.random.normal(ks[2], (C, Cq), jnp.float32) * 0.1
    bq = jax.random.normal(ks[3], (Cq,), jnp.float32) * 0.1
    wk = jax.random.normal(ks[4], (C, Cq), jnp.float32) * 0.1
    bk = jax.random.normal(ks[5], (Cq,), jnp.float32) * 0.1
    wv = jax.random.normal(ks[6], (C, C), jnp.float32) * 0.1
    bv = jax.random.normal(ks[7], (C,), jnp.float32) * 0.1

    # gamma = 0 (module init): residual path must be exact.
    gamma0 = jnp.zeros((), jnp.float32)
    out0 = mam_module_pallas(x1, x2, wq, bq, wk, bk, wv, bv, gamma0, q_tile=64)
    jax.block_until_ready(out0)
    ref0 = mam_module_ref(x1, x2, wq, bq, wk, bk, wv, bv, gamma0)
    assert jnp.allclose(out0, ref0, atol=2e-2, rtol=2e-2)

    # Non-zero gamma exercises the full attention compute, tiled over queries.
    g_nz = jnp.asarray(0.7, jnp.float32)
    out_nz = mam_module_pallas(x1, x2, wq, bq, wk, bk, wv, bv, g_nz, q_tile=64)
    jax.block_until_ready(out_nz)
    ref_nz = mam_module_ref(x1, x2, wq, bq, wk, bk, wv, bv, g_nz)
    assert jnp.allclose(out_nz, ref_nz, atol=2e-2, rtol=2e-2)

    # Default (single-tile) path.
    out_full = mam_module_pallas(x1, x2, wq, bq, wk, bk, wv, bv, g_nz)
    jax.block_until_ready(out_full)
    assert jnp.allclose(out_full, ref_nz, atol=2e-2, rtol=2e-2)

    print("KERNEL_OK")
</pallas_src>

<mosaic_0001>
module attributes {stable_mosaic.version = 11 : i64} {
  func.func @_proj_kernel(%arg0: i32, %arg1: i32, %arg2: memref<1x64x32xbf16, #tpu.memory_space<vmem>>, %arg3: memref<1x64x32xbf16, #tpu.memory_space<vmem>>, %arg4: memref<32x8xbf16, #tpu.memory_space<vmem>>, %arg5: memref<1x8xf32, #tpu.memory_space<vmem>>, %arg6: memref<32x32xbf16, #tpu.memory_space<vmem>>, %arg7: memref<1x32xf32, #tpu.memory_space<vmem>>, %arg8: memref<1x64x4xbf16, #tpu.memory_space<vmem>>, %arg9: memref<1x64x4xbf16, #tpu.memory_space<vmem>>, %arg10: memref<1x64x4xbf16, #tpu.memory_space<vmem>>, %arg11: memref<1x64x4xbf16, #tpu.memory_space<vmem>>, %arg12: memref<1x64x32xbf16, #tpu.memory_space<vmem>>) attributes {dimension_semantics = [#tpu.dimension_semantics<parallel>, #tpu.dimension_semantics<parallel>], iteration_bounds = array<i64: 2, 4>, scalar_prefetch = 0 : i64, scratch_operands = 0 : i64, tpu.core_type = #tpu.core_type<tc>, window_params = [{transform_indices = @transform_0, window_bounds = array<i64: 1, 64, 32>}, {transform_indices = @transform_1, window_bounds = array<i64: 1, 64, 32>}, {pipeline_mode = #tpu.pipeline_mode<synchronous>, transform_indices = @transform_2, window_bounds = array<i64: 32, 8>}, {pipeline_mode = #tpu.pipeline_mode<synchronous>, transform_indices = @transform_3, window_bounds = array<i64: 1, 8>}, {pipeline_mode = #tpu.pipeline_mode<synchronous>, transform_indices = @transform_4, window_bounds = array<i64: 32, 32>}, {pipeline_mode = #tpu.pipeline_mode<synchronous>, transform_indices = @transform_5, window_bounds = array<i64: 1, 32>}, {transform_indices = @transform_6, window_bounds = array<i64: 1, 64, 4>}, {transform_indices = @transform_7, window_bounds = array<i64: 1, 64, 4>}, {transform_indices = @transform_8, window_bounds = array<i64: 1, 64, 4>}, {transform_indices = @transform_9, window_bounds = array<i64: 1, 64, 4>}, {transform_indices = @transform_10, window_bounds = array<i64: 1, 64, 32>}]} {
    %c0 = arith.constant 0 : index
    %c0_0 = arith.constant 0 : index
    %c0_1 = arith.constant 0 : index
    %0 = vector.load %arg2[%c0, %c0_0, %c0_1] : memref<1x64x32xbf16, #tpu.memory_space<vmem>>, vector<1x64x32xbf16>
    %1 = vector.shape_cast %0 : vector<1x64x32xbf16> to vector<64x32xbf16>
    %c0_2 = arith.constant 0 : index
    %c0_3 = arith.constant 0 : index
    %c0_4 = arith.constant 0 : index
    %2 = vector.load %arg3[%c0_2, %c0_3, %c0_4] : memref<1x64x32xbf16, #tpu.memory_space<vmem>>, vector<1x64x32xbf16>
    %3 = vector.shape_cast %2 : vector<1x64x32xbf16> to vector<64x32xbf16>
    %c0_5 = arith.constant 0 : index
    %c0_6 = arith.constant 0 : index
    %4 = vector.load %arg4[%c0_5, %c0_6] : memref<32x8xbf16, #tpu.memory_space<vmem>>, vector<32x8xbf16>
    %cst = arith.constant dense<0.000000e+00> : vector<64x8xf32>
    %5 = tpu.matmul %1, %4, %cst {dimension_numbers = #tpu.dot_dimension_numbers<[1], [0], [0], [1], [0, 0, 1, 1], [], []>} : vector<64x32xbf16>, vector<32x8xbf16>, vector<64x8xf32> -> vector<64x8xf32>
    %c0_7 = arith.constant 0 : index
    %c0_8 = arith.constant 0 : index
    %6 = vector.load %arg5[%c0_7, %c0_8] : memref<1x8xf32, #tpu.memory_space<vmem>>, vector<1x8xf32>
    %7 = vector.broadcast %6 : vector<1x8xf32> to vector<64x8xf32>
    %8 = arith.addf %5, %7 : vector<64x8xf32>
    %c0_9 = arith.constant 0 : index
    %c0_10 = arith.constant 0 : index
    %9 = vector.load %arg4[%c0_9, %c0_10] : memref<32x8xbf16, #tpu.memory_space<vmem>>, vector<32x8xbf16>
    %cst_11 = arith.constant dense<0.000000e+00> : vector<64x8xf32>
    %10 = tpu.matmul %3, %9, %cst_11 {dimension_numbers = #tpu.dot_dimension_numbers<[1], [0], [0], [1], [0, 0, 1, 1], [], []>} : vector<64x32xbf16>, vector<32x8xbf16>, vector<64x8xf32> -> vector<64x8xf32>
    %c0_12 = arith.constant 0 : index
    %c0_13 = arith.constant 0 : index
    %11 = vector.load %arg5[%c0_12, %c0_13] : memref<1x8xf32, #tpu.memory_space<vmem>>, vector<1x8xf32>
    %12 = vector.broadcast %11 : vector<1x8xf32> to vector<64x8xf32>
    %13 = arith.addf %10, %12 : vector<64x8xf32>
    %c0_14 = arith.constant 0 : index
    %c0_15 = arith.constant 0 : index
    %14 = vector.load %arg6[%c0_14, %c0_15] : memref<32x32xbf16, #tpu.memory_space<vmem>>, vector<32x32xbf16>
    %cst_16 = arith.constant dense<0.000000e+00> : vector<64x32xf32>
    %15 = tpu.matmul %3, %14, %cst_16 {dimension_numbers = #tpu.dot_dimension_numbers<[1], [0], [0], [1], [0, 0, 1, 1], [], []>} : vector<64x32xbf16>, vector<32x32xbf16>, vector<64x32xf32> -> vector<64x32xf32>
    %c0_17 = arith.constant 0 : index
    %c0_18 = arith.constant 0 : index
    %16 = vector.load %arg7[%c0_17, %c0_18] : memref<1x32xf32, #tpu.memory_space<vmem>>, vector<1x32xf32>
    %17 = vector.broadcast %16 : vector<1x32xf32> to vector<64x32xf32>
    %18 = arith.addf %15, %17 : vector<64x32xf32>
    %19 = vector.extract_strided_slice %8 {offsets = [0, 0], sizes = [64, 4], strides = [1, 1]} : vector<64x8xf32> to vector<64x4xf32>
    %20 = arith.truncf %19 : vector<64x4xf32> to vector<64x4xbf16>
    %c0_19 = arith.constant 0 : index
    %c0_20 = arith.constant 0 : index
    %c0_21 = arith.constant 0 : index
    %21 = vector.load %arg8[%c0_19, %c0_20, %c0_21] : memref<1x64x4xbf16, #tpu.memory_space<vmem>>, vector<1x64x4xbf16>
    %22 = vector.shape_cast %21 : vector<1x64x4xbf16> to vector<64x4xbf16>
    %23 = vector.shape_cast %20 : vector<64x4xbf16> to vector<1x64x4xbf16>
    tpu.vector_store %arg8[%c0_19, %c0_20, %c0_21], %23 {strides = array<i32>} : memref<1x64x4xbf16, #tpu.memory_space<vmem>>, vector<1x64x4xbf16>,
    %24 = vector.extract_strided_slice %8 {offsets = [0, 4], sizes = [64, 4], strides = [1, 1]} : vector<64x8xf32> to vector<64x4xf32>
    %25 = arith.truncf %24 : vector<64x4xf32> to vector<64x4xbf16>
    %c0_22 = arith.constant 0 : index
    %c0_23 = arith.constant 0 : index
    %c0_24 = arith.constant 0 : index
    %26 = vector.load %arg9[%c0_22, %c0_23, %c0_24] : memref<1x64x4xbf16, #tpu.memory_space<vmem>>, vector<1x64x4xbf16>
    %27 = vector.shape_cast %26 : vector<1x64x4xbf16> to vector<64x4xbf16>
    %28 = vector.shape_cast %25 : vector<64x4xbf16> to vector<1x64x4xbf16>
    tpu.vector_store %arg9[%c0_22, %c0_23, %c0_24], %28 {strides = array<i32>} : memref<1x64x4xbf16, #tpu.memory_space<vmem>>, vector<1x64x4xbf16>,
    %29 = vector.extract_strided_slice %13 {offsets = [0, 0], sizes = [64, 4], strides = [1, 1]} : vector<64x8xf32> to vector<64x4xf32>
    %30 = arith.truncf %29 : vector<64x4xf32> to vector<64x4xbf16>
    %c0_25 = arith.constant 0 : index
    %c0_26 = arith.constant 0 : index
    %c0_27 = arith.constant 0 : index
    %31 = vector.load %arg10[%c0_25, %c0_26, %c0_27] : memref<1x64x4xbf16, #tpu.memory_space<vmem>>, vector<1x64x4xbf16>
    %32 = vector.shape_cast %31 : vector<1x64x4xbf16> to vector<64x4xbf16>
    %33 = vector.shape_cast %30 : vector<64x4xbf16> to vector<1x64x4xbf16>
    tpu.vector_store %arg10[%c0_25, %c0_26, %c0_27], %33 {strides = array<i32>} : memref<1x64x4xbf16, #tpu.memory_space<vmem>>, vector<1x64x4xbf16>,
    %34 = vector.extract_strided_slice %13 {offsets = [0, 4], sizes = [64, 4], strides = [1, 1]} : vector<64x8xf32> to vector<64x4xf32>
    %35 = arith.truncf %34 : vector<64x4xf32> to vector<64x4xbf16>
    %c0_28 = arith.constant 0 : index
    %c0_29 = arith.constant 0 : index
    %c0_30 = arith.constant 0 : index
    %36 = vector.load %arg11[%c0_28, %c0_29, %c0_30] : memref<1x64x4xbf16, #tpu.memory_space<vmem>>, vector<1x64x4xbf16>
    %37 = vector.shape_cast %36 : vector<1x64x4xbf16> to vector<64x4xbf16>
    %38 = vector.shape_cast %35 : vector<64x4xbf16> to vector<1x64x4xbf16>
    tpu.vector_store %arg11[%c0_28, %c0_29, %c0_30], %38 {strides = array<i32>} : memref<1x64x4xbf16, #tpu.memory_space<vmem>>, vector<1x64x4xbf16>,
    %39 = arith.truncf %18 : vector<64x32xf32> to vector<64x32xbf16>
    %c0_31 = arith.constant 0 : index
    %c0_32 = arith.constant 0 : index
    %c0_33 = arith.constant 0 : index
    %40 = vector.load %arg12[%c0_31, %c0_32, %c0_33] : memref<1x64x32xbf16, #tpu.memory_space<vmem>>, vector<1x64x32xbf16>
    %41 = vector.shape_cast %40 : vector<1x64x32xbf16> to vector<64x32xbf16>
    %42 = vector.shape_cast %39 : vector<64x32xbf16> to vector<1x64x32xbf16>
    tpu.vector_store %arg12[%c0_31, %c0_32, %c0_33], %42 {strides = array<i32>} : memref<1x64x32xbf16, #tpu.memory_space<vmem>>, vector<1x64x32xbf16>,
    return
  }
  func.func @transform_0(%arg0: i32, %arg1: i32) -> (i32, i32, i32) {
    %c0_i32 = arith.constant 0 : i32
    %c0_i32_0 = arith.constant 0 : i32
    return %arg0, %arg1, %c0_i32 : i32, i32, i32
  }
  func.func @transform_1(%arg0: i32, %arg1: i32) -> (i32, i32, i32) {
    %c0_i32 = arith.constant 0 : i32
    %c0_i32_0 = arith.constant 0 : i32
    return %arg0, %arg1, %c0_i32 : i32, i32, i32
  }
  func.func @transform_2(%arg0: i32, %arg1: i32) -> (i32, i32) {
    %c0_i32 = arith.constant 0 : i32
    %c0_i32_0 = arith.constant 0 : i32
    %c0_i32_1 = arith.constant 0 : i32
    return %c0_i32, %c0_i32_0 : i32, i32
  }
  func.func @transform_3(%arg0: i32, %arg1: i32) -> (i32, i32) {
    %c0_i32 = arith.constant 0 : i32
    %c0_i32_0 = arith.constant 0 : i32
    %c0_i32_1 = arith.constant 0 : i32
    return %c0_i32, %c0_i32_0 : i32, i32
  }
  func.func @transform_4(%arg0: i32, %arg1: i32) -> (i32, i32) {
    %c0_i32 = arith.constant 0 : i32
    %c0_i32_0 = arith.constant 0 : i32
    %c0_i32_1 = arith.constant 0 : i32
    return %c0_i32, %c0_i32_0 : i32, i32
  }
  func.func @transform_5(%arg0: i32, %arg1: i32) -> (i32, i32) {
    %c0_i32 = arith.constant 0 : i32
    %c0_i32_0 = arith.constant 0 : i32
    %c0_i32_1 = arith.constant 0 : i32
    return %c0_i32, %c0_i32_0 : i32, i32
  }
  func.func @transform_6(%arg0: i32, %arg1: i32) -> (i32, i32, i32) {
    %c0_i32 = arith.constant 0 : i32
    %c0_i32_0 = arith.constant 0 : i32
    return %arg0, %arg1, %c0_i32 : i32, i32, i32
  }
  func.func @transform_7(%arg0: i32, %arg1: i32) -> (i32, i32, i32) {
    %c0_i32 = arith.constant 0 : i32
    %c0_i32_0 = arith.constant 0 : i32
    return %arg0, %arg1, %c0_i32 : i32, i32, i32
  }
  func.func @transform_8(%arg0: i32, %arg1: i32) -> (i32, i32, i32) {
    %c0_i32 = arith.constant 0 : i32
    %c0_i32_0 = arith.constant 0 : i32
    return %arg0, %arg1, %c0_i32 : i32, i32, i32
  }
  func.func @transform_9(%arg0: i32, %arg1: i32) -> (i32, i32, i32) {
    %c0_i32 = arith.constant 0 : i32
    %c0_i32_0 = arith.constant 0 : i32
    return %arg0, %arg1, %c0_i32 : i32, i32, i32
  }
  func.func @transform_10(%arg0: i32, %arg1: i32) -> (i32, i32, i32) {
    %c0_i32 = arith.constant 0 : i32
    %c0_i32_0 = arith.constant 0 : i32
    return %arg0, %arg1, %c0_i32 : i32, i32, i32
  }
}

module attributes {stable_mosaic.version = 11 : i64} {
  func.func @_proj_kernel(%arg0: i32, %arg1: i32, %arg2: memref<1x64x32xbf16, #tpu.memory_space<vmem>>, %arg3: memref<1x64x32xbf16, #tpu.memory_space<vmem>>, %arg4: memref<32x8xbf16, #tpu.memory_space<vmem>>, %arg5: memref<1x8xf32, #tpu.memory_space<vmem>>, %arg6: memref<32x32xbf16, #tpu.memory_space<vmem>>, %arg7: memref<1x32xf32, #tpu.memory_space<vmem>>, %arg8: memref<1x64x4xbf16, #tpu.memory_space<vmem>>, %arg9: memref<1x64x4xbf16, #tpu.memory_space<vmem>>, %arg10: memref<1x64x4xbf16, #tpu.memory_space<vmem>>, %arg11: memref<1x64x4xbf16, #tpu.memory_space<vmem>>, %arg12: memref<1x64x32xbf16, #tpu.memory_space<vmem>>) attributes {dimension_semantics = [#tpu.dimension_semantics<parallel>, #tpu.dimension_semantics<parallel>], iteration_bounds = array<i64: 2, 4>, scalar_prefetch = 0 : i64, scratch_operands = 0 : i64, tpu.core_type = #tpu.core_type<tc>, window_params = [{transform_indices = @transform_0, window_bounds = array<i64: 1, 64, 32>}, {transform_indices = @transform_1, window_bounds = array<i64: 1, 64, 32>}, {pipeline_mode = #tpu.pipeline_mode<synchronous>, transform_indices = @transform_2, window_bounds = array<i64: 32, 8>}, {pipeline_mode = #tpu.pipeline_mode<synchronous>, transform_indices = @transform_3, window_bounds = array<i64: 1, 8>}, {pipeline_mode = #tpu.pipeline_mode<synchronous>, transform_indices = @transform_4, window_bounds = array<i64: 32, 32>}, {pipeline_mode = #tpu.pipeline_mode<synchronous>, transform_indices = @transform_5, window_bounds = array<i64: 1, 32>}, {transform_indices = @transform_6, window_bounds = array<i64: 1, 64, 4>}, {transform_indices = @transform_7, window_bounds = array<i64: 1, 64, 4>}, {transform_indices = @transform_8, window_bounds = array<i64: 1, 64, 4>}, {transform_indices = @transform_9, window_bounds = array<i64: 1, 64, 4>}, {transform_indices = @transform_10, window_bounds = array<i64: 1, 64, 32>}]} {
    %c0 = arith.constant 0 : index
    %c0_0 = arith.constant 0 : index
    %c0_1 = arith.constant 0 : index
    %0 = vector.load %arg2[%c0, %c0_0, %c0_1] : memref<1x64x32xbf16, #tpu.memory_space<vmem>>, vector<1x64x32xbf16>
    %1 = vector.shape_cast %0 : vector<1x64x32xbf16> to vector<64x32xbf16>
    %c0_2 = arith.constant 0 : index
    %c0_3 = arith.constant 0 : index
    %c0_4 = arith.constant 0 : index
    %2 = vector.load %arg3[%c0_2, %c0_3, %c0_4] : memref<1x64x32xbf16, #tpu.memory_space<vmem>>, vector<1x64x32xbf16>
    %3 = vector.shape_cast %2 : vector<1x64x32xbf16> to vector<64x32xbf16>
    %c0_5 = arith.constant 0 : index
    %c0_6 = arith.constant 0 : index
    %4 = vector.load %arg4[%c0_5, %c0_6] : memref<32x8xbf16, #tpu.memory_space<vmem>>, vector<32x8xbf16>
    %cst = arith.constant dense<0.000000e+00> : vector<64x8xf32>
    %5 = tpu.matmul %1, %4, %cst {dimension_numbers = #tpu.dot_dimension_numbers<[1], [0], [0], [1], [0, 0, 1, 1], [], []>} : vector<64x32xbf16>, vector<32x8xbf16>, vector<64x8xf32> -> vector<64x8xf32>
    %c0_7 = arith.constant 0 : index
    %c0_8 = arith.constant 0 : index
    %6 = vector.load %arg5[%c0_7, %c0_8] : memref<1x8xf32, #tpu.memory_space<vmem>>, vector<1x8xf32>
    %7 = vector.broadcast %6 : vector<1x8xf32> to vector<64x8xf32>
    %8 = arith.addf %5, %7 : vector<64x8xf32>
    %c0_9 = arith.constant 0 : index
    %c0_10 = arith.constant 0 : index
    %9 = vector.load %arg4[%c0_9, %c0_10] : memref<32x8xbf16, #tpu.memory_space<vmem>>, vector<32x8xbf16>
    %cst_11 = arith.constant dense<0.000000e+00> : vector<64x8xf32>
    %10 = tpu.matmul %3, %9, %cst_11 {dimension_numbers = #tpu.dot_dimension_numbers<[1], [0], [0], [1], [0, 0, 1, 1], [], []>} : vector<64x32xbf16>, vector<32x8xbf16>, vector<64x8xf32> -> vector<64x8xf32>
    %c0_12 = arith.constant 0 : index
    %c0_13 = arith.constant 0 : index
    %11 = vector.load %arg5[%c0_12, %c0_13] : memref<1x8xf32, #tpu.memory_space<vmem>>, vector<1x8xf32>
    %12 = vector.broadcast %11 : vector<1x8xf32> to vector<64x8xf32>
    %13 = arith.addf %10, %12 : vector<64x8xf32>
    %c0_14 = arith.constant 0 : index
    %c0_15 = arith.constant 0 : index
    %14 = vector.load %arg6[%c0_14, %c0_15] : memref<32x32xbf16, #tpu.memory_space<vmem>>, vector<32x32xbf16>
    %cst_16 = arith.constant dense<0.000000e+00> : vector<64x32xf32>
    %15 = tpu.matmul %3, %14, %cst_16 {dimension_numbers = #tpu.dot_dimension_numbers<[1], [0], [0], [1], [0, 0, 1, 1], [], []>} : vector<64x32xbf16>, vector<32x32xbf16>, vector<64x32xf32> -> vector<64x32xf32>
    %c0_17 = arith.constant 0 : index
    %c0_18 = arith.constant 0 : index
    %16 = vector.load %arg7[%c0_17, %c0_18] : memref<1x32xf32, #tpu.memory_space<vmem>>, vector<1x32xf32>
    %17 = vector.broadcast %16 : vector<1x32xf32> to vector<64x32xf32>
    %18 = arith.addf %15, %17 : vector<64x32xf32>
    %19 = vector.extract_strided_slice %8 {offsets = [0, 0], sizes = [64, 4], strides = [1, 1]} : vector<64x8xf32> to vector<64x4xf32>
    %20 = arith.truncf %19 : vector<64x4xf32> to vector<64x4xbf16>
    %c0_19 = arith.constant 0 : index
    %c0_20 = arith.constant 0 : index
    %c0_21 = arith.constant 0 : index
    %21 = vector.load %arg8[%c0_19, %c0_20, %c0_21] : memref<1x64x4xbf16, #tpu.memory_space<vmem>>, vector<1x64x4xbf16>
    %22 = vector.shape_cast %21 : vector<1x64x4xbf16> to vector<64x4xbf16>
    %23 = vector.shape_cast %20 : vector<64x4xbf16> to vector<1x64x4xbf16>
    tpu.vector_store %arg8[%c0_19, %c0_20, %c0_21], %23 {strides = array<i32>} : memref<1x64x4xbf16, #tpu.memory_space<vmem>>, vector<1x64x4xbf16>,
    %24 = vector.extract_strided_slice %8 {offsets = [0, 4], sizes = [64, 4], strides = [1, 1]} : vector<64x8xf32> to vector<64x4xf32>
    %25 = arith.truncf %24 : vector<64x4xf32> to vector<64x4xbf16>
    %c0_22 = arith.constant 0 : index
    %c0_23 = arith.constant 0 : index
    %c0_24 = arith.constant 0 : index
    %26 = vector.load %arg9[%c0_22, %c0_23, %c0_24] : memref<1x64x4xbf16, #tpu.memory_space<vmem>>, vector<1x64x4xbf16>
    %27 = vector.shape_cast %26 : vector<1x64x4xbf16> to vector<64x4xbf16>
    %28 = vector.shape_cast %25 : vector<64x4xbf16> to vector<1x64x4xbf16>
    tpu.vector_store %arg9[%c0_22, %c0_23, %c0_24], %28 {strides = array<i32>} : memref<1x64x4xbf16, #tpu.memory_space<vmem>>, vector<1x64x4xbf16>,
    %29 = vector.extract_strided_slice %13 {offsets = [0, 0], sizes = [64, 4], strides = [1, 1]} : vector<64x8xf32> to vector<64x4xf32>
    %30 = arith.truncf %29 : vector<64x4xf32> to vector<64x4xbf16>
    %c0_25 = arith.constant 0 : index
    %c0_26 = arith.constant 0 : index
    %c0_27 = arith.constant 0 : index
    %31 = vector.load %arg10[%c0_25, %c0_26, %c0_27] : memref<1x64x4xbf16, #tpu.memory_space<vmem>>, vector<1x64x4xbf16>
    %32 = vector.shape_cast %31 : vector<1x64x4xbf16> to vector<64x4xbf16>
    %33 = vector.shape_cast %30 : vector<64x4xbf16> to vector<1x64x4xbf16>
    tpu.vector_store %arg10[%c0_25, %c0_26, %c0_27], %33 {strides = array<i32>} : memref<1x64x4xbf16, #tpu.memory_space<vmem>>, vector<1x64x4xbf16>,
    %34 = vector.extract_strided_slice %13 {offsets = [0, 4], sizes = [64, 4], strides = [1, 1]} : vector<64x8xf32> to vector<64x4xf32>
    %35 = arith.truncf %34 : vector<64x4xf32> to vector<64x4xbf16>
    %c0_28 = arith.constant 0 : index
    %c0_29 = arith.constant 0 : index
    %c0_30 = arith.constant 0 : index
    %36 = vector.load %arg11[%c0_28, %c0_29, %c0_30] : memref<1x64x4xbf16, #tpu.memory_space<vmem>>, vector<1x64x4xbf16>
    %37 = vector.shape_cast %36 : vector<1x64x4xbf16> to vector<64x4xbf16>
    %38 = vector.shape_cast %35 : vector<64x4xbf16> to vector<1x64x4xbf16>
    tpu.vector_store %arg11[%c0_28, %c0_29, %c0_30], %38 {strides = array<i32>} : memref<1x64x4xbf16, #tpu.memory_space<vmem>>, vector<1x64x4xbf16>,
    %39 = arith.truncf %18 : vector<64x32xf32> to vector<64x32xbf16>
    %c0_31 = arith.constant 0 : index
    %c0_32 = arith.constant 0 : index
    %c0_33 = arith.constant 0 : index
    %40 = vector.load %arg12[%c0_31, %c0_32, %c0_33] : memref<1x64x32xbf16, #tpu.memory_space<vmem>>, vector<1x64x32xbf16>
    %41 = vector.shape_cast %40 : vector<1x64x32xbf16> to vector<64x32xbf16>
    %42 = vector.shape_cast %39 : vector<64x32xbf16> to vector<1x64x32xbf16>
    tpu.vector_store %arg12[%c0_31, %c0_32, %c0_33], %42 {strides = array<i32>} : memref<1x64x32xbf16, #tpu.memory_space<vmem>>, vector<1x64x32xbf16>,
    return
  }
  func.func @transform_0(%arg0: i32, %arg1: i32) -> (i32, i32, i32) {
    %c0_i32 = arith.constant 0 : i32
    %c0_i32_0 = arith.constant 0 : i32
    return %arg0, %arg1, %c0_i32 : i32, i32, i32
  }
  func.func @transform_1(%arg0: i32, %arg1: i32) -> (i32, i32, i32) {
    %c0_i32 = arith.constant 0 : i32
    %c0_i32_0 = arith.constant 0 : i32
    return %arg0, %arg1, %c0_i32 : i32, i32, i32
  }
  func.func @transform_2(%arg0: i32, %arg1: i32) -> (i32, i32) {
    %c0_i32 = arith.constant 0 : i32
    %c0_i32_0 = arith.constant 0 : i32
    %c0_i32_1 = arith.constant 0 : i32
    return %c0_i32, %c0_i32_0 : i32, i32
  }
  func.func @transform_3(%arg0: i32, %arg1: i32) -> (i32, i32) {
    %c0_i32 = arith.constant 0 : i32
    %c0_i32_0 = arith.constant 0 : i32
    %c0_i32_1 = arith.constant 0 : i32
    return %c0_i32, %c0_i32_0 : i32, i32
  }
  func.func @transform_4(%arg0: i32, %arg1: i32) -> (i32, i32) {
    %c0_i32 = arith.constant 0 : i32
    %c0_i32_0 = arith.constant 0 : i32
    %c0_i32_1 = arith.constant 0 : i32
    return %c0_i32, %c0_i32_0 : i32, i32
  }
  func.func @transform_5(%arg0: i32, %arg1: i32) -> (i32, i32) {
    %c0_i32 = arith.constant 0 : i32
    %c0_i32_0 = arith.constant 0 : i32
    %c0_i32_1 = arith.constant 0 : i32
    return %c0_i32, %c0_i32_0 : i32, i32
  }
  func.func @transform_6(%arg0: i32, %arg1: i32) -> (i32, i32, i32) {
    %c0_i32 = arith.constant 0 : i32
    %c0_i32_0 = arith.constant 0 : i32
    return %arg0, %arg1, %c0_i32 : i32, i32, i32
  }
  func.func @transform_7(%arg0: i32, %arg1: i32) -> (i32, i32, i32) {
    %c0_i32 = arith.constant 0 : i32
    %c0_i32_0 = arith.constant 0 : i32
    return %arg0, %arg1, %c0_i32 : i32, i32, i32
  }
  func.func @transform_8(%arg0: i32, %arg1: i32) -> (i32, i32, i32) {
    %c0_i32 = arith.constant 0 : i32
    %c0_i32_0 = arith.constant 0 : i32
    return %arg0, %arg1, %c0_i32 : i32, i32, i32
  }
  func.func @transform_9(%arg0: i32, %arg1: i32) -> (i32, i32, i32) {
    %c0_i32 = arith.constant 0 : i32
    %c0_i32_0 = arith.constant 0 : i32
    return %arg0, %arg1, %c0_i32 : i32, i32, i32
  }
  func.func @transform_10(%arg0: i32, %arg1: i32) -> (i32, i32, i32) {
    %c0_i32 = arith.constant 0 : i32
    %c0_i32_0 = arith.constant 0 : i32
    return %arg0, %arg1, %c0_i32 : i32, i32, i32
  }
}

</mosaic_0001>

<bundles_post_ra>
// kernel: tpu_custom_call.1
= control target key start
LH: loop header
LB: loop body
LE: loop exit
PB: predicated region body
PF: predicated region fallthrough
CT: control target
= control target key end

     0   :  { %s1654_s13 = smov 0   ;;  %s1656_s14 = smov 0   ;;  %s1873_s0 = inlined_call_operand.vmem [shape: bf16[2,256,32], index: 0, kind: input, shape index: {}]   ;;  %s1874_s1 = inlined_call_operand.vmem [shape: bf16[2,256,32], index: 1, kind: input, shape index: {}]   ;;  %s1875_s2 = inlined_call_operand.vmem [shape: bf16[32,8], index: 2, kind: input, shape index: {}]   ;;  %s1876_s3 = inlined_call_operand.vmem [shape: f32[1,8], index: 3, kind: input, shape index: {}]   ;;  %s1877_s4 = inlined_call_operand.vmem [shape: bf16[32,32], index: 4, kind: input, shape index: {}]   ;;  %s1878_s5 = inlined_call_operand.vmem [shape: f32[1,32], index: 5, kind: input, shape index: {}]   ;;  %s1879_s6 = inlined_call_operand.vmem [shape: bf16[2,256,4], index: 6, kind: output, shape index: {0}]   ;;  %s1880_s7 = inlined_call_operand.vmem [shape: bf16[2,256,4], index: 7, kind: output, shape index: {1}]   ;;  %s1881_s8 = inlined_call_operand.vmem [shape: bf16[2,256,4], index: 8, kind: output, shape index: {2}]   ;;  %s1882_s9 = inlined_call_operand.vmem [shape: bf16[2,256,4], index: 9, kind: output, shape index: {3}]   ;;  %s1883_s10 = inlined_call_operand.vmem [shape: bf16[2,256,32], index: 10, kind: output, shape index: {4}]  }
   0x1   :  { %s1658_s15 = smov 0   ;;  %s1660_s16 = smov 0  }
   0x2   :  { %s1662_s17 = smov 0  }
   0x3 LB: > { %s30_s18 = sadd.s32 1, %s1588_s15  ;;  %s33_s19 = sadd.s32 1, %s1592_s16  ;;  %s1596_s17 = sphi %s1662_s17, %s21_s17   ;;  %s1592_s16 = sphi %s1660_s16, %s1887_s16   ;;  %s1588_s15 = sphi %s1658_s15, %s1886_s15   ;;  %s1584_s14 = sphi %s1656_s14, %s1885_s14   ;;  %s1580_s13 = sphi %s1654_s13, %s1884_s13  }
   0x4   : > { %p31_p0 = scmp.ge.s32.totalorder %s30_s18, 4  ;;  %p1349_p1 = scmp.ge.s32.totalorder %s1596_s17, 1 }
   0x5   : > { %p367_p2 = scmp.lt.s32.totalorder %s1596_s17, 9 }
   0x6   : > { %s1889_s18 = smov (%p31_p0, %s30_s18), 0  ;;  %s1891_s19 = smov (!%p31_p0, %s33_s19), %s1592_s16 }
   0x7   : > { %p368_p3 = pnand %p1349_p1, %p367_p2  ;;  %p35_p4 = scmp.ge.s32.totalorder %s1891_s19, 2 }
   0x8   : > { %s1350_s22 = sshll.u32 (!%p368_p3), %s1580_s13, 3  ;;  %p459_p5 = scmp.lt.s32.totalorder (!%p368_p3), %s1584_s14, 1 }
   0x9   : > { %s1893_s19 = smov (%p35_p4, %s1891_s19), 0  ;;  %371 = sbr.rel (%p368_p3) target bundleno = 365 (0x16d), region = 44 }
   0xa   : > { %p461_p6 = scmp.lt.s32.totalorder (!%p368_p3), %s1350_s22, 31 }
   0xe   : > { %v1546_v0 = vld [vmem:[%s1875_s2 + $0x8] sm:$0xff]   ;;  %v1547_v1 = vld [vmem:[%s1875_s2] sm:$0xff]   ;;  %s1895_s14 = smov (!%p459_p5, %s1584_s14), 1  ;;  %s1897_s22 = smov (!%p461_p6, %s1350_s22), 31  ;;  %vm588_vm0 = vcmask 261120   ;;  %vm883_vm1 = vcmask 27648  }
   0xf   : > { %1465 = vmatprep.subr.bf16.mxu0 %v1546_v0  ;;  %1501 = vmatprep.subr.bf16.mxu1 %v1546_v0  ;;  %v1556_v2 = vld [vmem:[%s1877_s4 + $0x8] sm:$0xff]   ;;  %s1351_s27 = sshll.u32 %s1895_s14, 5  ;;  %v1557_v5 = vld [vmem:[%s1877_s4] sm:$0xff]   ;;  %vm1028_vm2 = vcmask 257024  }
  0x10   : > { %1466 = vmatpush3.bf16.msra.mxu0 %v1546_v0  ;;  %1503 = vmatpush3.bf16.msra.mxu1 %v1546_v0  ;;  %s464_s28 = sadd.s32 %s1351_s27, %s1897_s22  ;;  %v1721_v12 = vld [vmem:[%s1876_s3] ss:$0 sm:$0xff] }
  0x11   : > { %1467 = vmatprep.subr.bf16.mxu0 %v1547_v1  ;;  %1502 = vmatprep.subr.bf16.mxu1 %v1547_v1  ;;  %s1693_s29 = sshll.u32 %s464_s28, 2  ;;  %s1598_s28 = smov 124   ;;  %v1744_v30 = vld [vmem:[%s1878_s5] ss:$0 sm:$0xff] }
  0x12   : > { %s466_s12 = scalar_lea.vmem %s1873_s0, %s1693_s29  ;;  %s476_s14 = scalar_lea.vmem %s1874_s1, %s1693_s29 }
  0x13   : > { %v1548_v3 = vld [vmem:[%s466_s12] sm:$0xff]   ;;  %v1549_v4 = vld [vmem:[%s466_s12 + $0x10] sm:$0xff]   ;;  %v1550_v6 = vld [vmem:[%s466_s12 + $0x8] sm:$0xff]   ;;  %s1728_s27 = scalar_lea.vmem %s1879_s6, %s1693_s29  ;;  %s1764_s20 = scalar_lea.vmem %s1883_s10, %s1693_s29 }
  0x14   : > { %1468 = vmatpush3.bf16.msra.mxu0 %v1547_v1  ;;  %1504 = vmatpush3.bf16.msra.mxu1 %v1547_v1  ;;  %v1551_v7 = vld [vmem:[%s466_s12 + $0x18] sm:$0xff]   ;;  %v1552_v8 = vld [vmem:[%s476_s14] sm:$0xff]   ;;  %v1553_v9 = vld [vmem:[%s476_s14 + $0x8] sm:$0xff]   ;;  %s1772_s22 = scalar_lea.vmem %s1881_s8, %s1693_s29  ;;  %s496_s25 = scalar_lea.vmem %s1880_s7, %s1693_s29 }
  0x15   : > { %1477 = vmatprep.subr.bf16.mxu1 %v1546_v0  ;;  %1489 = vmatprep.subr.bf16.mxu0 %v1556_v2  ;;  %v1554_v10 = vld [vmem:[%s476_s14 + $0x10] sm:$0xff]   ;;  %v1555_v11 = vld [vmem:[%s476_s14 + $0x18] sm:$0xff]  }
  0x16   : > { %1469 = vmatprep.mubr.msk.bf16.mxu0 %vm588_vm0, %v1548_v3  ;;  %1473 = vmatprep.mubr.msk.bf16.mxu1 %vm588_vm0, %v1549_v4 }
  0x17   : > { %1470 = vmatmul.mubr.msk.bf16.vlgmr.msra.gmra.mxu0 %vm588_vm0, %v1550_v6  ;;  %1474 = vmatmul.mubr.msk.bf16.vlgmr.msra.gmra.mxu1 %vm588_vm0, %v1551_v7 }
  0x18   : > { %1490 = vmatpush3.bf16.msra.mxu0 %v1556_v2  ;;  %1478 = vmatpush3.bf16.msra.mxu1 %v1546_v0 }
  0x19   : > { %1481 = vmatprep.mubr.msk.bf16.mxu1 %vm588_vm0, %v1552_v8  ;;  %1479 = vmatprep.subr.bf16.mxu1 %v1547_v1 }
  0x1a   : > { %1491 = vmatprep.subr.bf16.mxu0 %v1557_v5  ;;  %1493 = vmatprep.mubr.msk.bf16.mxu0 %vm588_vm0, %v1552_v8 }
  0x1c   : > { %1492 = vmatpush3.bf16.msra.mxu0 %v1557_v5  ;;  %1480 = vmatpush3.bf16.msra.mxu1 %v1547_v1 }
  0x1f   : > { %1494 = vmatmul.mubr.msk.bf16.vlgmr.msra.gmra.mxu0 %vm588_vm0, %v1553_v9  ;;  %1482 = vmatmul.mubr.msk.bf16.vlgmr.msra.gmra.mxu1 %vm588_vm0, %v1553_v9 }
  0x20   : > { %1497 = vmatprep.mubr.msk.bf16.mxu0 %vm588_vm0, %v1554_v10  ;;  %1485 = vmatprep.mubr.msk.bf16.mxu1 %vm588_vm0, %v1554_v10 }
  0x27   : > { %1498 = vmatmul.mubr.msk.bf16.gmra.mxu0 %vm588_vm0, %v1555_v11  ;;  %1486 = vmatmul.mubr.msk.bf16.gmra.mxu1 %vm588_vm0, %v1555_v11 }
  0xd7   : > { %v1471_v13 = vpop.f32.mrf.mxu0  ;;  %v1475_v15 = vpop.f32.mrf.mxu1 }
  0xd8   : > { %v644_v14 = vadd.f32 %v1471_v13, %v1721_v12  ;;  %v660_v16 = vadd.f32 %v1475_v15, %v1721_v12 }
  0xd9   : > { %v635_v17 = vpop.f32.mrf.mxu0  ;;  %v651_v20 = vpop.f32.mrf.mxu1 }
  0xda   : > { %v1425_v18 = vpack.c.bf16 %v644_v14, %v644_v14  ;;  %v636_v19 = vadd.f32 %v1721_v12, %v635_v17  ;;  %v1429_v21 = vpack.c.bf16 %v660_v16, %v660_v16  ;;  %v652_v22 = vadd.f32 %v1721_v12, %v651_v20 }
  0xdb   : > { %v1472_v23 = vpop.f32.mrf.mxu0  ;;  %v1476_v26 = vpop.f32.mrf.mxu1 }
  0xdc   : > { %886 = vst.msk [vmem:[%s1728_s27 + $0x8] sm:$0xf] %vm883_vm1, %v1425_v18  ;;  %v1423_v24 = vpack.c.bf16 %v636_v19, %v636_v19  ;;  %v647_v25 = vadd.f32 %v1472_v23, %v1721_v12  ;;  %896 = vrot.lane.b32.xlu1 %v1425_v18, %s1598_s28  ;;  %890 = vst.msk [vmem:[%s1728_s27 + $0x18] sm:$0xf] %vm883_vm1, %v1429_v21  ;;  %v1427_v27 = vpack.c.bf16 %v652_v22, %v652_v22 }
  0xdd   : > { %v663_v28 = vadd.f32 %v1476_v26, %v1721_v12  ;;  %904 = vrot.lane.b32.xlu0 %v1429_v21, %s1598_s28  ;;  %v638_v29 = vpop.f32.mrf.mxu0  ;;  %v654_v33 = vpop.f32.mrf.mxu1 }
  0xde   : > { %884 = vst.msk [vmem:[%s1728_s27] sm:$0xf] %vm883_vm1, %v1423_v24  ;;  %v1426_v31 = vpack.c.bf16 %v647_v25, %v647_v25  ;;  %v639_v32 = vadd.f32 %v1721_v12, %v638_v29  ;;  %888 = vst.msk [vmem:[%s1728_s27 + $0x10] sm:$0xf] %vm883_vm1, %v1427_v27  ;;  %v655_v35 = vadd.f32 %v1721_v12, %v654_v33 }
  0xdf   : > { %v1430_v34 = vpack.c.bf16 %v663_v28, %v663_v28  ;;  %v1495_v36 = vpop.f32.mrf.mxu0  ;;  %v1483_v38 = vpop.f32.mrf.mxu1 }
  0xe0   : > { %887 = vst.msk [vmem:[%s1728_s27 + $0xc] sm:$0xf] %vm883_vm1, %v1426_v31  ;;  %v1424_v37 = vpack.c.bf16 %v639_v32, %v639_v32  ;;  %898 = vrot.lane.b32.xlu1 %v1426_v31, %s1598_s28  ;;  %v829_v39 = vadd.f32 %v1495_v36, %v1744_v30  ;;  %v1428_v40 = vpack.c.bf16 %v655_v35, %v655_v35 }
  0xe1   : > { %891 = vst.msk [vmem:[%s1728_s27 + $0x1c] sm:$0xf] %vm883_vm1, %v1430_v34  ;;  %v741_v41 = vadd.f32 %v1483_v38, %v1721_v12  ;;  %892 = vrot.lane.b32.xlu0 %v1423_v24, %s1598_s28  ;;  %v820_v42 = vpop.f32.mrf.mxu0  ;;  %v732_v43 = vpop.f32.mrf.mxu1 }
  0xe2   : > { %885 = vst.msk [vmem:[%s1728_s27 + $0x4] sm:$0xf] %vm883_vm1, %v1424_v37  ;;  %v1441_v44 = vpack.c.bf16 %v829_v39, %v829_v39  ;;  %v821_v45 = vadd.f32 %v1744_v30, %v820_v42  ;;  %889 = vst.msk [vmem:[%s1728_s27 + $0x14] sm:$0xf] %vm883_vm1, %v1428_v40  ;;  %v733_v47 = vadd.f32 %v1721_v12, %v732_v43 }
  0xe3   : > { %v1433_v46 = vpack.c.bf16 %v741_v41, %v741_v41  ;;  %v1496_v48 = vpop.f32.mrf.mxu0  ;;  %v1484_v49 = vpop.f32.mrf.mxu1 }
  0xe4   : > { %906 = vrot.lane.b32.xlu1 %v1430_v34, %s1598_s28  ;;  %1031 = vst.msk [vmem:[%s1764_s20 + $0x8] sm:$0xf] %vm1028_vm2, %v1441_v44  ;;  %v1439_v50 = vpack.c.bf16 %v821_v45, %v821_v45  ;;  %v832_v51 = vadd.f32 %v1496_v48, %v1744_v30  ;;  %v1431_v52 = vpack.c.bf16 %v733_v47, %v733_v47 }
  0xe5   : > { %958 = vst.msk [vmem:[%s1772_s22 + $0x8] sm:$0xf] %vm883_vm1, %v1433_v46  ;;  %v744_v53 = vadd.f32 %v1484_v49, %v1721_v12  ;;  %900 = vrot.lane.b32.xlu0 %v1427_v27, %s1598_s28  ;;  %v823_v54 = vpop.f32.mrf.mxu0  ;;  %v735_v55 = vpop.f32.mrf.mxu1 }
  0xe6   : > { %1029 = vst.msk [vmem:[%s1764_s20] sm:$0xf] %vm1028_vm2, %v1439_v50  ;;  %v1442_v56 = vpack.c.bf16 %v832_v51, %v832_v51  ;;  %v824_v57 = vadd.f32 %v1744_v30, %v823_v54  ;;  %v736_v59 = vadd.f32 %v1721_v12, %v735_v55 }
  0xe7   : > { %956 = vst.msk [vmem:[%s1772_s22] sm:$0xf] %vm883_vm1, %v1431_v52  ;;  %v1434_v58 = vpack.c.bf16 %v744_v53, %v744_v53  ;;  %v1499_v60 = vpop.f32.mrf.mxu0  ;;  %v1487_v61 = vpop.f32.mrf.mxu1 }
  0xe8   : > { %902 = vrot.lane.b32.xlu1 %v1428_v40, %s1598_s28  ;;  %1032 = vst.msk [vmem:[%s1764_s20 + $0xc] sm:$0xf] %vm1028_vm2, %v1442_v56  ;;  %v1440_v62 = vpack.c.bf16 %v824_v57, %v824_v57  ;;  %v845_v63 = vadd.f32 %v1499_v60, %v1744_v30  ;;  %v1432_v0 = vpack.c.bf16 %v736_v59, %v736_v59 }
  0xe9   : > { %959 = vst.msk [vmem:[%s1772_s22 + $0xc] sm:$0xf] %vm883_vm1, %v1434_v58  ;;  %v757_v1 = vadd.f32 %v1487_v61, %v1721_v12  ;;  %894 = vrot.lane.b32.xlu0 %v1424_v37, %s1598_s28  ;;  %v836_v2 = vpop.f32.mrf.mxu0  ;;  %v748_v3 = vpop.f32.mrf.mxu1 }
  0xea   : > { %1030 = vst.msk [vmem:[%s1764_s20 + $0x4] sm:$0xf] %vm1028_vm2, %v1440_v62  ;;  %v1445_v4 = vpack.c.bf16 %v845_v63, %v845_v63  ;;  %v837_v5 = vadd.f32 %v1744_v30, %v836_v2  ;;  %v749_v7 = vadd.f32 %v1721_v12, %v748_v3 }
  0xeb   : > { %957 = vst.msk [vmem:[%s1772_s22 + $0x4] sm:$0xf] %vm883_vm1, %v1432_v0  ;;  %v1437_v6 = vpack.c.bf16 %v757_v1, %v757_v1  ;;  %v1500_v8 = vpop.f32.mrf.mxu0  ;;  %v1488_v9 = vpop.f32.mrf.mxu1 }
  0xec   : > { %970 = vrot.lane.b32.xlu1 %v1434_v58, %s1598_s28  ;;  %1035 = vst.msk [vmem:[%s1764_s20 + $0x18] sm:$0xf] %vm1028_vm2, %v1445_v4  ;;  %v1443_v10 = vpack.c.bf16 %v837_v5, %v837_v5  ;;  %v848_v11 = vadd.f32 %v1500_v8, %v1744_v30  ;;  %v1435_v13 = vpack.c.bf16 %v749_v7, %v749_v7 }
  0xed   : > { %962 = vst.msk [vmem:[%s1772_s22 + $0x18] sm:$0xf] %vm883_vm1, %v1437_v6  ;;  %v760_v14 = vadd.f32 %v1488_v9, %v1721_v12  ;;  %968 = vrot.lane.b32.xlu0 %v1433_v46, %s1598_s28  ;;  %v839_v15 = vpop.f32.mrf.mxu0  ;;  %v751_v16 = vpop.f32.mrf.mxu1 }
  0xee   : > { %1033 = vst.msk [vmem:[%s1764_s20 + $0x10] sm:$0xf] %vm1028_vm2, %v1443_v10  ;;  %v1446_v17 = vpack.c.bf16 %v848_v11, %v848_v11  ;;  %v840_v18 = vadd.f32 %v1744_v30, %v839_v15  ;;  %v752_v20 = vadd.f32 %v1721_v12, %v751_v16 }
  0xef   : > { %960 = vst.msk [vmem:[%s1772_s22 + $0x10] sm:$0xf] %vm883_vm1, %v1435_v13  ;;  %v1438_v19 = vpack.c.bf16 %v760_v14, %v760_v14 }
  0xf0   : > { %966 = vrot.lane.b32.xlu1 %v1432_v0, %s1598_s28  ;;  %1036 = vst.msk [vmem:[%s1764_s20 + $0x1c] sm:$0xf] %vm1028_vm2, %v1446_v17  ;;  %v1444_v21 = vpack.c.bf16 %v840_v18, %v840_v18  ;;  %v1436_v22 = vpack.c.bf16 %v752_v20, %v752_v20 }
  0xf1   : > { %963 = vst.msk [vmem:[%s1772_s22 + $0x1c] sm:$0xf] %vm883_vm1, %v1438_v19  ;;  %964 = vrot.lane.b32.xlu0 %v1431_v52, %s1598_s28 }
  0xf2   : > { %1034 = vst.msk [vmem:[%s1764_s20 + $0x14] sm:$0xf] %vm1028_vm2, %v1444_v21 }
  0xf3   : > { %961 = vst.msk [vmem:[%s1772_s22 + $0x14] sm:$0xf] %vm883_vm1, %v1436_v22 }
  0xf4   : > { %974 = vrot.lane.b32.xlu1 %v1436_v22, %s1598_s28 }
  0xf5   : > { %972 = vrot.lane.b32.xlu0 %v1435_v13, %s1598_s28 }
  0xf8   : > { %978 = vrot.lane.b32.xlu1 %v1438_v19, %s1598_s28 }
  0xf9   : > { %976 = vrot.lane.b32.xlu0 %v1437_v6, %s1598_s28  ;;  %s516_s28 = scalar_lea.vmem %s1882_s9, %s1693_s29 }
 0x14e   : > { %v897_v12 = vpop.permute.xlu1 %896 }
 0x14f   : > { %v905_v23 = vpop.permute.xlu0 %904  ;;  %918 = vst.msk [vmem:[%s496_s25 + $0x8] sm:$0xf] %vm883_vm1, %v897_v12 }
 0x150   : > { %922 = vst.msk [vmem:[%s496_s25 + $0x18] sm:$0xf] %vm883_vm1, %v905_v23 }
 0x152   : > { %v899_v24 = vpop.permute.xlu1 %898 }
 0x153   : > { %919 = vst.msk [vmem:[%s496_s25 + $0xc] sm:$0xf] %vm883_vm1, %v899_v24  ;;  %v893_v25 = vpop.permute.xlu0 %892 }
 0x154   : > { %916 = vst.msk [vmem:[%s496_s25] sm:$0xf] %vm883_vm1, %v893_v25 }
 0x156   : > { %v907_v26 = vpop.permute.xlu1 %906 }
 0x157   : > { %923 = vst.msk [vmem:[%s496_s25 + $0x1c] sm:$0xf] %vm883_vm1, %v907_v26  ;;  %v901_v27 = vpop.permute.xlu0 %900 }
 0x158   : > { %920 = vst.msk [vmem:[%s496_s25 + $0x10] sm:$0xf] %vm883_vm1, %v901_v27 }
 0x15a   : > { %v903_v28 = vpop.permute.xlu1 %902 }
 0x15b   : > { %921 = vst.msk [vmem:[%s496_s25 + $0x14] sm:$0xf] %vm883_vm1, %v903_v28  ;;  %v895_v29 = vpop.permute.xlu0 %894 }
 0x15c   : > { %917 = vst.msk [vmem:[%s496_s25 + $0x4] sm:$0xf] %vm883_vm1, %v895_v29 }
 0x15e   : > { %v971_v30 = vpop.permute.xlu1 %970 }
 0x15f   : > { %991 = vst.msk [vmem:[%s516_s28 + $0xc] sm:$0xf] %vm883_vm1, %v971_v30  ;;  %v969_v31 = vpop.permute.xlu0 %968 }
 0x160   : > { %990 = vst.msk [vmem:[%s516_s28 + $0x8] sm:$0xf] %vm883_vm1, %v969_v31 }
 0x162   : > { %v967_v32 = vpop.permute.xlu1 %966 }
 0x163   : > { %989 = vst.msk [vmem:[%s516_s28 + $0x4] sm:$0xf] %vm883_vm1, %v967_v32  ;;  %v965_v33 = vpop.permute.xlu0 %964 }
 0x164   : > { %988 = vst.msk [vmem:[%s516_s28] sm:$0xf] %vm883_vm1, %v965_v33 }
 0x166   : > { %v975_v34 = vpop.permute.xlu1 %974 }
 0x167   : > { %993 = vst.msk [vmem:[%s516_s28 + $0x14] sm:$0xf] %vm883_vm1, %v975_v34  ;;  %v973_v35 = vpop.permute.xlu0 %972 }
 0x168   : > { %992 = vst.msk [vmem:[%s516_s28 + $0x10] sm:$0xf] %vm883_vm1, %v973_v35 }
 0x16a   : > { %v979_v36 = vpop.permute.xlu1 %978 }
 0x16b   : > { %995 = vst.msk [vmem:[%s516_s28 + $0x1c] sm:$0xf] %vm883_vm1, %v979_v36  ;;  %v977_v37 = vpop.permute.xlu0 %976 }
 0x16c   : > { %994 = vst.msk [vmem:[%s516_s28 + $0x18] sm:$0xf] %vm883_vm1, %v977_v37 }
 0x16d PF: > { %s21_s17 = sadd.s32 1, %s1596_s17   ;;  %s1884_s13 = smov %s1588_s15 }
 0x16e   : > { %p18_p7 = scmp.ge.s32.totalorder %s21_s17, 10   ;;  %s1885_s14 = smov %s1592_s16 }
 0x16f   : > { %s1886_s15 = smov %s1889_s18  ;;  %s1887_s16 = smov %s1893_s19 }
 0x170   :  { %20 = sbr.rel (!%p18_p7) target bundleno = 3 (0x3), region = 125 }

// kernel: tpu_custom_call.1
= control target key start
LH: loop header
LB: loop body
LE: loop exit
PB: predicated region body
PF: predicated region fallthrough
CT: control target
= control target key end

     0   :  { %s1654_s13 = smov 0   ;;  %s1656_s14 = smov 0   ;;  %s1873_s0 = inlined_call_operand.vmem [shape: bf16[2,256,32], index: 0, kind: input, shape index: {}]   ;;  %s1874_s1 = inlined_call_operand.vmem [shape: bf16[2,256,32], index: 1, kind: input, shape index: {}]   ;;  %s1875_s2 = inlined_call_operand.vmem [shape: bf16[32,8], index: 2, kind: input, shape index: {}]   ;;  %s1876_s3 = inlined_call_operand.vmem [shape: f32[1,8], index: 3, kind: input, shape index: {}]   ;;  %s1877_s4 = inlined_call_operand.vmem [shape: bf16[32,32], index: 4, kind: input, shape index: {}]   ;;  %s1878_s5 = inlined_call_operand.vmem [shape: f32[1,32], index: 5, kind: input, shape index: {}]   ;;  %s1879_s6 = inlined_call_operand.vmem [shape: bf16[2,256,4], index: 6, kind: output, shape index: {0}]   ;;  %s1880_s7 = inlined_call_operand.vmem [shape: bf16[2,256,4], index: 7, kind: output, shape index: {1}]   ;;  %s1881_s8 = inlined_call_operand.vmem [shape: bf16[2,256,4], index: 8, kind: output, shape index: {2}]   ;;  %s1882_s9 = inlined_call_operand.vmem [shape: bf16[2,256,4], index: 9, kind: output, shape index: {3}]   ;;  %s1883_s10 = inlined_call_operand.vmem [shape: bf16[2,256,32], index: 10, kind: output, shape index: {4}]  }
   0x1   :  { %s1658_s15 = smov 0   ;;  %s1660_s16 = smov 0  }
   0x2   :  { %s1662_s17 = smov 0  }
   0x3 LB: > { %s30_s18 = sadd.s32 1, %s1588_s15  ;;  %s33_s19 = sadd.s32 1, %s1592_s16  ;;  %s1596_s17 = sphi %s1662_s17, %s21_s17   ;;  %s1592_s16 = sphi %s1660_s16, %s1887_s16   ;;  %s1588_s15 = sphi %s1658_s15, %s1886_s15   ;;  %s1584_s14 = sphi %s1656_s14, %s1885_s14   ;;  %s1580_s13 = sphi %s1654_s13, %s1884_s13  }
   0x4   : > { %p31_p0 = scmp.ge.s32.totalorder %s30_s18, 4  ;;  %p1349_p1 = scmp.ge.s32.totalorder %s1596_s17, 1 }
   0x5   : > { %p367_p2 = scmp.lt.s32.totalorder %s1596_s17, 9 }
   0x6   : > { %s1889_s18 = smov (%p31_p0, %s30_s18), 0  ;;  %s1891_s19 = smov (!%p31_p0, %s33_s19), %s1592_s16 }
   0x7   : > { %p368_p3 = pnand %p1349_p1, %p367_p2  ;;  %p35_p4 = scmp.ge.s32.totalorder %s1891_s19, 2 }
   0x8   : > { %s1350_s22 = sshll.u32 (!%p368_p3), %s1580_s13, 3  ;;  %p459_p5 = scmp.lt.s32.totalorder (!%p368_p3), %s1584_s14, 1 }
   0x9   : > { %s1893_s19 = smov (%p35_p4, %s1891_s19), 0  ;;  %371 = sbr.rel (%p368_p3) target bundleno = 365 (0x16d), region = 44 }
   0xa   : > { %p461_p6 = scmp.lt.s32.totalorder (!%p368_p3), %s1350_s22, 31 }
   0xe   : > { %v1546_v0 = vld [vmem:[%s1875_s2 + $0x8] sm:$0xff]   ;;  %v1547_v1 = vld [vmem:[%s1875_s2] sm:$0xff]   ;;  %s1895_s14 = smov (!%p459_p5, %s1584_s14), 1  ;;  %s1897_s22 = smov (!%p461_p6, %s1350_s22), 31  ;;  %vm588_vm0 = vcmask 261120   ;;  %vm883_vm1 = vcmask 27648  }
   0xf   : > { %1465 = vmatprep.subr.bf16.mxu0 %v1546_v0  ;;  %1501 = vmatprep.subr.bf16.mxu1 %v1546_v0  ;;  %v1556_v2 = vld [vmem:[%s1877_s4 + $0x8] sm:$0xff]   ;;  %s1351_s27 = sshll.u32 %s1895_s14, 5  ;;  %v1557_v5 = vld [vmem:[%s1877_s4] sm:$0xff]   ;;  %vm1028_vm2 = vcmask 257024  }
  0x10   : > { %1466 = vmatpush3.bf16.msra.mxu0 %v1546_v0  ;;  %1503 = vmatpush3.bf16.msra.mxu1 %v1546_v0  ;;  %s464_s28 = sadd.s32 %s1351_s27, %s1897_s22  ;;  %v1721_v12 = vld [vmem:[%s1876_s3] ss:$0 sm:$0xff] }
  0x11   : > { %1467 = vmatprep.subr.bf16.mxu0 %v1547_v1  ;;  %1502 = vmatprep.subr.bf16.mxu1 %v1547_v1  ;;  %s1693_s29 = sshll.u32 %s464_s28, 2  ;;  %s1598_s28 = smov 124   ;;  %v1744_v30 = vld [vmem:[%s1878_s5] ss:$0 sm:$0xff] }
  0x12   : > { %s466_s12 = scalar_lea.vmem %s1873_s0, %s1693_s29  ;;  %s476_s14 = scalar_lea.vmem %s1874_s1, %s1693_s29 }
  0x13   : > { %v1548_v3 = vld [vmem:[%s466_s12] sm:$0xff]   ;;  %v1549_v4 = vld [vmem:[%s466_s12 + $0x10] sm:$0xff]   ;;  %v1550_v6 = vld [vmem:[%s466_s12 + $0x8] sm:$0xff]   ;;  %s1728_s27 = scalar_lea.vmem %s1879_s6, %s1693_s29  ;;  %s1764_s20 = scalar_lea.vmem %s1883_s10, %s1693_s29 }
  0x14   : > { %1468 = vmatpush3.bf16.msra.mxu0 %v1547_v1  ;;  %1504 = vmatpush3.bf16.msra.mxu1 %v1547_v1  ;;  %v1551_v7 = vld [vmem:[%s466_s12 + $0x18] sm:$0xff]   ;;  %v1552_v8 = vld [vmem:[%s476_s14] sm:$0xff]   ;;  %v1553_v9 = vld [vmem:[%s476_s14 + $0x8] sm:$0xff]   ;;  %s1772_s22 = scalar_lea.vmem %s1881_s8, %s1693_s29  ;;  %s496_s25 = scalar_lea.vmem %s1880_s7, %s1693_s29 }
  0x15   : > { %1477 = vmatprep.subr.bf16.mxu1 %v1546_v0  ;;  %1489 = vmatprep.subr.bf16.mxu0 %v1556_v2  ;;  %v1554_v10 = vld [vmem:[%s476_s14 + $0x10] sm:$0xff]   ;;  %v1555_v11 = vld [vmem:[%s476_s14 + $0x18] sm:$0xff]  }
  0x16   : > { %1469 = vmatprep.mubr.msk.bf16.mxu0 %vm588_vm0, %v1548_v3  ;;  %1473 = vmatprep.mubr.msk.bf16.mxu1 %vm588_vm0, %v1549_v4 }
  0x17   : > { %1470 = vmatmul.mubr.msk.bf16.vlgmr.msra.gmra.mxu0 %vm588_vm0, %v1550_v6  ;;  %1474 = vmatmul.mubr.msk.bf16.vlgmr.msra.gmra.mxu1 %vm588_vm0, %v1551_v7 }
  0x18   : > { %1490 = vmatpush3.bf16.msra.mxu0 %v1556_v2  ;;  %1478 = vmatpush3.bf16.msra.mxu1 %v1546_v0 }
  0x19   : > { %1481 = vmatprep.mubr.msk.bf16.mxu1 %vm588_vm0, %v1552_v8  ;;  %1479 = vmatprep.subr.bf16.mxu1 %v1547_v1 }
  0x1a   : > { %1491 = vmatprep.subr.bf16.mxu0 %v1557_v5  ;;  %1493 = vmatprep.mubr.msk.bf16.mxu0 %vm588_vm0, %v1552_v8 }
  0x1c   : > { %1492 = vmatpush3.bf16.msra.mxu0 %v1557_v5  ;;  %1480 = vmatpush3.bf16.msra.mxu1 %v1547_v1 }
  0x1f   : > { %1494 = vmatmul.mubr.msk.bf16.vlgmr.msra.gmra.mxu0 %vm588_vm0, %v1553_v9  ;;  %1482 = vmatmul.mubr.msk.bf16.vlgmr.msra.gmra.mxu1 %vm588_vm0, %v1553_v9 }
  0x20   : > { %1497 = vmatprep.mubr.msk.bf16.mxu0 %vm588_vm0, %v1554_v10  ;;  %1485 = vmatprep.mubr.msk.bf16.mxu1 %vm588_vm0, %v1554_v10 }
  0x27   : > { %1498 = vmatmul.mubr.msk.bf16.gmra.mxu0 %vm588_vm0, %v1555_v11  ;;  %1486 = vmatmul.mubr.msk.bf16.gmra.mxu1 %vm588_vm0, %v1555_v11 }
  0xd7   : > { %v1471_v13 = vpop.f32.mrf.mxu0  ;;  %v1475_v15 = vpop.f32.mrf.mxu1 }
  0xd8   : > { %v644_v14 = vadd.f32 %v1471_v13, %v1721_v12  ;;  %v660_v16 = vadd.f32 %v1475_v15, %v1721_v12 }
  0xd9   : > { %v635_v17 = vpop.f32.mrf.mxu0  ;;  %v651_v20 = vpop.f32.mrf.mxu1 }
  0xda   : > { %v1425_v18 = vpack.c.bf16 %v644_v14, %v644_v14  ;;  %v636_v19 = vadd.f32 %v1721_v12, %v635_v17  ;;  %v1429_v21 = vpack.c.bf16 %v660_v16, %v660_v16  ;;  %v652_v22 = vadd.f32 %v1721_v12, %v651_v20 }
  0xdb   : > { %v1472_v23 = vpop.f32.mrf.mxu0  ;;  %v1476_v26 = vpop.f32.mrf.mxu1 }
  0xdc   : > { %886 = vst.msk [vmem:[%s1728_s27 + $0x8] sm:$0xf] %vm883_vm1, %v1425_v18  ;;  %v1423_v24 = vpack.c.bf16 %v636_v19, %v636_v19  ;;  %v647_v25 = vadd.f32 %v1472_v23, %v1721_v12  ;;  %896 = vrot.lane.b32.xlu1 %v1425_v18, %s1598_s28  ;;  %890 = vst.msk [vmem:[%s1728_s27 + $0x18] sm:$0xf] %vm883_vm1, %v1429_v21  ;;  %v1427_v27 = vpack.c.bf16 %v652_v22, %v652_v22 }
  0xdd   : > { %v663_v28 = vadd.f32 %v1476_v26, %v1721_v12  ;;  %904 = vrot.lane.b32.xlu0 %v1429_v21, %s1598_s28  ;;  %v638_v29 = vpop.f32.mrf.mxu0  ;;  %v654_v33 = vpop.f32.mrf.mxu1 }
  0xde   : > { %884 = vst.msk [vmem:[%s1728_s27] sm:$0xf] %vm883_vm1, %v1423_v24  ;;  %v1426_v31 = vpack.c.bf16 %v647_v25, %v647_v25  ;;  %v639_v32 = vadd.f32 %v1721_v12, %v638_v29  ;;  %888 = vst.msk [vmem:[%s1728_s27 + $0x10] sm:$0xf] %vm883_vm1, %v1427_v27  ;;  %v655_v35 = vadd.f32 %v1721_v12, %v654_v33 }
  0xdf   : > { %v1430_v34 = vpack.c.bf16 %v663_v28, %v663_v28  ;;  %v1495_v36 = vpop.f32.mrf.mxu0  ;;  %v1483_v38 = vpop.f32.mrf.mxu1 }
  0xe0   : > { %887 = vst.msk [vmem:[%s1728_s27 + $0xc] sm:$0xf] %vm883_vm1, %v1426_v31  ;;  %v1424_v37 = vpack.c.bf16 %v639_v32, %v639_v32  ;;  %898 = vrot.lane.b32.xlu1 %v1426_v31, %s1598_s28  ;;  %v829_v39 = vadd.f32 %v1495_v36, %v1744_v30  ;;  %v1428_v40 = vpack.c.bf16 %v655_v35, %v655_v35 }
  0xe1   : > { %891 = vst.msk [vmem:[%s1728_s27 + $0x1c] sm:$0xf] %vm883_vm1, %v1430_v34  ;;  %v741_v41 = vadd.f32 %v1483_v38, %v1721_v12  ;;  %892 = vrot.lane.b32.xlu0 %v1423_v24, %s1598_s28  ;;  %v820_v42 = vpop.f32.mrf.mxu0  ;;  %v732_v43 = vpop.f32.mrf.mxu1 }
  0xe2   : > { %885 = vst.msk [vmem:[%s1728_s27 + $0x4] sm:$0xf] %vm883_vm1, %v1424_v37  ;;  %v1441_v44 = vpack.c.bf16 %v829_v39, %v829_v39  ;;  %v821_v45 = vadd.f32 %v1744_v30, %v820_v42  ;;  %889 = vst.msk [vmem:[%s1728_s27 + $0x14] sm:$0xf] %vm883_vm1, %v1428_v40  ;;  %v733_v47 = vadd.f32 %v1721_v12, %v732_v43 }
  0xe3   : > { %v1433_v46 = vpack.c.bf16 %v741_v41, %v741_v41  ;;  %v1496_v48 = vpop.f32.mrf.mxu0  ;;  %v1484_v49 = vpop.f32.mrf.mxu1 }
  0xe4   : > { %906 = vrot.lane.b32.xlu1 %v1430_v34, %s1598_s28  ;;  %1031 = vst.msk [vmem:[%s1764_s20 + $0x8] sm:$0xf] %vm1028_vm2, %v1441_v44  ;;  %v1439_v50 = vpack.c.bf16 %v821_v45, %v821_v45  ;;  %v832_v51 = vadd.f32 %v1496_v48, %v1744_v30  ;;  %v1431_v52 = vpack.c.bf16 %v733_v47, %v733_v47 }
  0xe5   : > { %958 = vst.msk [vmem:[%s1772_s22 + $0x8] sm:$0xf] %vm883_vm1, %v1433_v46  ;;  %v744_v53 = vadd.f32 %v1484_v49, %v1721_v12  ;;  %900 = vrot.lane.b32.xlu0 %v1427_v27, %s1598_s28  ;;  %v823_v54 = vpop.f32.mrf.mxu0  ;;  %v735_v55 = vpop.f32.mrf.mxu1 }
  0xe6   : > { %1029 = vst.msk [vmem:[%s1764_s20] sm:$0xf] %vm1028_vm2, %v1439_v50  ;;  %v1442_v56 = vpack.c.bf16 %v832_v51, %v832_v51  ;;  %v824_v57 = vadd.f32 %v1744_v30, %v823_v54  ;;  %v736_v59 = vadd.f32 %v1721_v12, %v735_v55 }
  0xe7   : > { %956 = vst.msk [vmem:[%s1772_s22] sm:$0xf] %vm883_vm1, %v1431_v52  ;;  %v1434_v58 = vpack.c.bf16 %v744_v53, %v744_v53  ;;  %v1499_v60 = vpop.f32.mrf.mxu0  ;;  %v1487_v61 = vpop.f32.mrf.mxu1 }
  0xe8   : > { %902 = vrot.lane.b32.xlu1 %v1428_v40, %s1598_s28  ;;  %1032 = vst.msk [vmem:[%s1764_s20 + $0xc] sm:$0xf] %vm1028_vm2, %v1442_v56  ;;  %v1440_v62 = vpack.c.bf16 %v824_v57, %v824_v57  ;;  %v845_v63 = vadd.f32 %v1499_v60, %v1744_v30  ;;  %v1432_v0 = vpack.c.bf16 %v736_v59, %v736_v59 }
  0xe9   : > { %959 = vst.msk [vmem:[%s1772_s22 + $0xc] sm:$0xf] %vm883_vm1, %v1434_v58  ;;  %v757_v1 = vadd.f32 %v1487_v61, %v1721_v12  ;;  %894 = vrot.lane.b32.xlu0 %v1424_v37, %s1598_s28  ;;  %v836_v2 = vpop.f32.mrf.mxu0  ;;  %v748_v3 = vpop.f32.mrf.mxu1 }
  0xea   : > { %1030 = vst.msk [vmem:[%s1764_s20 + $0x4] sm:$0xf] %vm1028_vm2, %v1440_v62  ;;  %v1445_v4 = vpack.c.bf16 %v845_v63, %v845_v63  ;;  %v837_v5 = vadd.f32 %v1744_v30, %v836_v2  ;;  %v749_v7 = vadd.f32 %v1721_v12, %v748_v3 }
  0xeb   : > { %957 = vst.msk [vmem:[%s1772_s22 + $0x4] sm:$0xf] %vm883_vm1, %v1432_v0  ;;  %v1437_v6 = vpack.c.bf16 %v757_v1, %v757_v1  ;;  %v1500_v8 = vpop.f32.mrf.mxu0  ;;  %v1488_v9 = vpop.f32.mrf.mxu1 }
  0xec   : > { %970 = vrot.lane.b32.xlu1 %v1434_v58, %s1598_s28  ;;  %1035 = vst.msk [vmem:[%s1764_s20 + $0x18] sm:$0xf] %vm1028_vm2, %v1445_v4  ;;  %v1443_v10 = vpack.c.bf16 %v837_v5, %v837_v5  ;;  %v848_v11 = vadd.f32 %v1500_v8, %v1744_v30  ;;  %v1435_v13 = vpack.c.bf16 %v749_v7, %v749_v7 }
  0xed   : > { %962 = vst.msk [vmem:[%s1772_s22 + $0x18] sm:$0xf] %vm883_vm1, %v1437_v6  ;;  %v760_v14 = vadd.f32 %v1488_v9, %v1721_v12  ;;  %968 = vrot.lane.b32.xlu0 %v1433_v46, %s1598_s28  ;;  %v839_v15 = vpop.f32.mrf.mxu0  ;;  %v751_v16 = vpop.f32.mrf.mxu1 }
  0xee   : > { %1033 = vst.msk [vmem:[%s1764_s20 + $0x10] sm:$0xf] %vm1028_vm2, %v1443_v10  ;;  %v1446_v17 = vpack.c.bf16 %v848_v11, %v848_v11  ;;  %v840_v18 = vadd.f32 %v1744_v30, %v839_v15  ;;  %v752_v20 = vadd.f32 %v1721_v12, %v751_v16 }
  0xef   : > { %960 = vst.msk [vmem:[%s1772_s22 + $0x10] sm:$0xf] %vm883_vm1, %v1435_v13  ;;  %v1438_v19 = vpack.c.bf16 %v760_v14, %v760_v14 }
  0xf0   : > { %966 = vrot.lane.b32.xlu1 %v1432_v0, %s1598_s28  ;;  %1036 = vst.msk [vmem:[%s1764_s20 + $0x1c] sm:$0xf] %vm1028_vm2, %v1446_v17  ;;  %v1444_v21 = vpack.c.bf16 %v840_v18, %v840_v18  ;;  %v1436_v22 = vpack.c.bf16 %v752_v20, %v752_v20 }
  0xf1   : > { %963 = vst.msk [vmem:[%s1772_s22 + $0x1c] sm:$0xf] %vm883_vm1, %v1438_v19  ;;  %964 = vrot.lane.b32.xlu0 %v1431_v52, %s1598_s28 }
  0xf2   : > { %1034 = vst.msk [vmem:[%s1764_s20 + $0x14] sm:$0xf] %vm1028_vm2, %v1444_v21 }
  0xf3   : > { %961 = vst.msk [vmem:[%s1772_s22 + $0x14] sm:$0xf] %vm883_vm1, %v1436_v22 }
  0xf4   : > { %974 = vrot.lane.b32.xlu1 %v1436_v22, %s1598_s28 }
  0xf5   : > { %972 = vrot.lane.b32.xlu0 %v1435_v13, %s1598_s28 }
  0xf8   : > { %978 = vrot.lane.b32.xlu1 %v1438_v19, %s1598_s28 }
  0xf9   : > { %976 = vrot.lane.b32.xlu0 %v1437_v6, %s1598_s28  ;;  %s516_s28 = scalar_lea.vmem %s1882_s9, %s1693_s29 }
 0x14e   : > { %v897_v12 = vpop.permute.xlu1 %896 }
 0x14f   : > { %v905_v23 = vpop.permute.xlu0 %904  ;;  %918 = vst.msk [vmem:[%s496_s25 + $0x8] sm:$0xf] %vm883_vm1, %v897_v12 }
 0x150   : > { %922 = vst.msk [vmem:[%s496_s25 + $0x18] sm:$0xf] %vm883_vm1, %v905_v23 }
 0x152   : > { %v899_v24 = vpop.permute.xlu1 %898 }
 0x153   : > { %919 = vst.msk [vmem:[%s496_s25 + $0xc] sm:$0xf] %vm883_vm1, %v899_v24  ;;  %v893_v25 = vpop.permute.xlu0 %892 }
 0x154   : > { %916 = vst.msk [vmem:[%s496_s25] sm:$0xf] %vm883_vm1, %v893_v25 }
 0x156   : > { %v907_v26 = vpop.permute.xlu1 %906 }
 0x157   : > { %923 = vst.msk [vmem:[%s496_s25 + $0x1c] sm:$0xf] %vm883_vm1, %v907_v26  ;;  %v901_v27 = vpop.permute.xlu0 %900 }
 0x158   : > { %920 = vst.msk [vmem:[%s496_s25 + $0x10] sm:$0xf] %vm883_vm1, %v901_v27 }
 0x15a   : > { %v903_v28 = vpop.permute.xlu1 %902 }
 0x15b   : > { %921 = vst.msk [vmem:[%s496_s25 + $0x14] sm:$0xf] %vm883_vm1, %v903_v28  ;;  %v895_v29 = vpop.permute.xlu0 %894 }
 0x15c   : > { %917 = vst.msk [vmem:[%s496_s25 + $0x4] sm:$0xf] %vm883_vm1, %v895_v29 }
 0x15e   : > { %v971_v30 = vpop.permute.xlu1 %970 }
 0x15f   : > { %991 = vst.msk [vmem:[%s516_s28 + $0xc] sm:$0xf] %vm883_vm1, %v971_v30  ;;  %v969_v31 = vpop.permute.xlu0 %968 }
 0x160   : > { %990 = vst.msk [vmem:[%s516_s28 + $0x8] sm:$0xf] %vm883_vm1, %v969_v31 }
 0x162   : > { %v967_v32 = vpop.permute.xlu1 %966 }
 0x163   : > { %989 = vst.msk [vmem:[%s516_s28 + $0x4] sm:$0xf] %vm883_vm1, %v967_v32  ;;  %v965_v33 = vpop.permute.xlu0 %964 }
 0x164   : > { %988 = vst.msk [vmem:[%s516_s28] sm:$0xf] %vm883_vm1, %v965_v33 }
 0x166   : > { %v975_v34 = vpop.permute.xlu1 %974 }
 0x167   : > { %993 = vst.msk [vmem:[%s516_s28 + $0x14] sm:$0xf] %vm883_vm1, %v975_v34  ;;  %v973_v35 = vpop.permute.xlu0 %972 }
 0x168   : > { %992 = vst.msk [vmem:[%s516_s28 + $0x10] sm:$0xf] %vm883_vm1, %v973_v35 }
 0x16a   : > { %v979_v36 = vpop.permute.xlu1 %978 }
 0x16b   : > { %995 = vst.msk [vmem:[%s516_s28 + $0x1c] sm:$0xf] %vm883_vm1, %v979_v36  ;;  %v977_v37 = vpop.permute.xlu0 %976 }
 0x16c   : > { %994 = vst.msk [vmem:[%s516_s28 + $0x18] sm:$0xf] %vm883_vm1, %v977_v37 }
 0x16d PF: > { %s21_s17 = sadd.s32 1, %s1596_s17   ;;  %s1884_s13 = smov %s1588_s15 }
 0x16e   : > { %p18_p7 = scmp.ge.s32.totalorder %s21_s17, 10   ;;  %s1885_s14 = smov %s1592_s16 }
 0x16f   : > { %s1886_s15 = smov %s1889_s18  ;;  %s1887_s16 = smov %s1893_s19 }
 0x170   :  { %20 = sbr.rel (!%p18_p7) target bundleno = 3 (0x3), region = 125 }

</bundles_post_ra>
